<compile_context>
chip_gen: v5e
topology: v5e:2x2
jax: 0.10.0
libtpu: 0.0.40
codegen_flags: <defaults>
</compile_context>

<pallas_src>
import jax
import jax.numpy as jnp
from jax.experimental import pallas as pl
from jax.experimental.pallas import tpu as pltpu

_LANE = 128                       # vreg lane width (last-dim alignment)
_TILE_BYTES_CAP = 8 * 1024 * 1024  # byte-based cap for one pipelined batch tile


def _round_up(n: int, m: int) -> int:
    return ((n + m - 1) // m) * m


def _sublane_for(dtype) -> int:
    # f32 -> 8 rows, bf16 -> 16, int8/fp8 -> 32 (sub-32-bit packs along sublanes).
    return max(8, 32 // jnp.dtype(dtype).itemsize)


def _vmem_budget() -> int:
    """Per-generation VMEM budget with headroom for compiler-internal scratch."""
    try:
        cap = int(pltpu.get_tpu_info().vmem_capacity_bytes)
    except Exception:
        cap = 64 << 20                      # conservative: v7x physical per-TC VMEM
    return max(32 << 20, (cap * 3) // 4)    # ~48 MiB on v7x, ~96 MiB on v5e/v6e


# ----------------------------------------------------------------------------
# Kernels
# ----------------------------------------------------------------------------
def _dense_transition_kernel(x_ref, law_t_ref, o_ref):
    # out[b, i] = sum_j x[b, j] * law_t[j, i]  ==  x @ law.T
    # law is pre-transposed / lane-padded on the host -> MXU fed directly.
    o_ref[...] = jnp.dot(
        x_ref[...], law_t_ref[...], preferred_element_type=jnp.float32
    ).astype(o_ref.dtype)


def _dense_tiled_kernel(x_ref, law_t_ref, o_ref, acc_ref):
    # K/N-tiled variant: f32 accumulator in VMEM, K is the last grid axis.
    @pl.when(pl.program_id(2) == 0)
    def _():
        acc_ref[...] = jnp.zeros_like(acc_ref)

    acc_ref[...] += jnp.dot(
        x_ref[...], law_t_ref[...], preferred_element_type=jnp.float32
    )

    @pl.when(pl.program_id(2) == pl.num_programs(2) - 1)
    def _():
        o_ref[...] = acc_ref[...].astype(o_ref.dtype)


# ----------------------------------------------------------------------------
# Tile selection
# ----------------------------------------------------------------------------
def _choose_batch_tile(batch: int, row_bytes: int, resident_bytes: int,
                       budget_bytes: int, sublane: int) -> int:
    """Largest batch tile (sublane-aligned) whose double-buffered footprint fits
    next to the resident (grid-invariant) bytes, capped by a byte budget, with
    at least 2 grid steps so the pipeline / megacore have work."""
    if batch <= sublane:
        return batch                            # single block == full (small) batch
    avail = max(budget_bytes - resident_bytes, 2 * sublane * row_bytes)
    tb = avail // (2 * row_bytes)               # x2: double-buffered x / out tiles
    tb = min(tb, max(_TILE_BYTES_CAP // row_bytes, sublane))   # byte-based cap
    tb = min(tb, pl.cdiv(batch, 2))             # >= 2 grid steps
    tb = max(sublane, (tb // sublane) * sublane)
    return int(tb)


# ----------------------------------------------------------------------------
# Dense (general) paths
# ----------------------------------------------------------------------------
def _dense_dim_transition(x, law_t, target_dim: int, budget: int):
    """out = x @ law.T with the law resident in VMEM (single-buffered)."""
    B, S = x.shape
    _, Tp = law_t.shape
    dtype = x.dtype
    itemsize = jnp.dtype(dtype).itemsize
    sublane = _sublane_for(dtype)

    law_bytes = S * Tp * itemsize                       # single buffer (Buffered(1))
    row_bytes = (S + Tp) * itemsize
    tb = _choose_batch_tile(B, row_bytes, law_bytes, budget, sublane)

    vmem_bytes = int(min(max(2 * tb * row_bytes + law_bytes + (1 << 20), 4 << 20),
                         budget))

    out = pl.pallas_call(
        _dense_transition_kernel,
        out_shape=jax.ShapeDtypeStruct((B, Tp), dtype),
        grid=(pl.cdiv(B, tb),),
        in_specs=[
            # x fed directly, no host pad: last dim == full source width.
            pl.BlockSpec((tb, S), lambda i: (i, 0)),
            # grid-invariant law: single-buffered, DMA'd once.
            pl.BlockSpec((S, Tp), lambda i: (0, 0), pipeline_mode=pl.Buffered(1)),
        ],
        out_specs=pl.BlockSpec((tb, Tp), lambda i: (i, 0)),
        compiler_params=pltpu.CompilerParams(
            dimension_semantics=("parallel",),
            vmem_limit_bytes=vmem_bytes,
        ),
    )(x, law_t)
    # Batch is exact (cdiv grid); only the lane slice may remain.
    return out if Tp == target_dim else out[:, :target_dim]


def _dense_dim_transition_tiled(x, law, target_dim: int, budget: int,
                                tk: int = 512, tn: int = 512):
    """K/N-tiled path for composition laws too large to keep resident:
    3-D grid (batch, N, K) with an f32 VMEM accumulator; K last, 'arbitrary'."""
    B, S = x.shape
    T = target_dim
    dtype = x.dtype
    itemsize = jnp.dtype(dtype).itemsize
    sublane = _sublane_for(dtype)

    tk = min(_round_up(max(S, 1), _LANE), tk)
    tn = min(_round_up(max(T, 1), _LANE), tn)
    Sp = _round_up(S, tk)
    Tp = _round_up(T, tn)

    law_t = jnp.zeros((Sp, Tp), dtype).at[:S, :T].set(jnp.asarray(law, dtype).T)
    x_p = x if Sp == S else jnp.pad(x, ((0, 0), (0, Sp - S)))

    resident = 2 * tk * tn * itemsize                      # double-buffered law tile
    row_bytes = 2 * (tk + tn) * itemsize + tn * 4          # dbl-buf x/out + f32 acc
    avail = max(budget - resident - (1 << 20), sublane * row_bytes)
    if B <= sublane:
        tb = B
    else:
        tb = min(avail // row_bytes, max(_TILE_BYTES_CAP // (tk * itemsize), sublane))
        tb = min(tb, pl.cdiv(B, 2))
        tb = max(sublane, (tb // sublane) * sublane)
    tb = int(tb)

    vmem_bytes = int(min(max(tb * row_bytes + resident + (1 << 20), 4 << 20), budget))

    out = pl.pallas_call(
        _dense_tiled_kernel,
        out_shape=jax.ShapeDtypeStruct((B, Tp), dtype),
        grid=(pl.cdiv(B, tb), Tp // tn, Sp // tk),
        in_specs=[
            pl.BlockSpec((tb, tk), lambda i, j, k: (i, k)),
            pl.BlockSpec((tk, tn), lambda i, j, k: (k, j)),
        ],
        out_specs=pl.BlockSpec((tb, tn), lambda i, j, k: (i, j)),
        scratch_shapes=[pltpu.VMEM((tb, tn), jnp.float32)],
        compiler_params=pltpu.CompilerParams(
            dimension_semantics=("parallel", "parallel", "arbitrary"),
            vmem_limit_bytes=vmem_bytes,
        ),
    )(x_p, law_t)
    return out if Tp == T else out[:, :T]


# ----------------------------------------------------------------------------
# Structural fast path (verified identity embed/truncate law)
# ----------------------------------------------------------------------------
def _structural_dim_transition(x, source_dim: int, target_dim: int):
    """eye[:T,:S] @ x_row == truncate (T<=S) or zero-pad (T>S): one XLA pass."""
    if target_dim <= source_dim:
        return x[:, :target_dim]
    return jnp.pad(x, ((0, 0), (0, target_dim - source_dim)))


# ----------------------------------------------------------------------------
# Module port
# ----------------------------------------------------------------------------
def make_composition_law(source_dim: int, target_dim: int, dtype=jnp.float32):
    """Deterministic synthetic composition law (structure-preserving embed/project).

    Shape (target_dim, source_dim): identity on the overlapping block, zeros
    elsewhere — the canonical dimension-transition map."""
    eye = jnp.eye(max(source_dim, target_dim), dtype=dtype)
    return eye[:target_dim, :source_dim]


class OperadicStructureHandlerPallas:
    """JAX/Pallas port of the forward pass of OperadicStructureHandler."""

    def __init__(self, base_dim: int, hidden_dim: int, motive_rank: int = 4,
                 dtype=jnp.float32):
        self.base_dim = base_dim
        self.hidden_dim = hidden_dim
        self.motive_rank = motive_rank
        self.dtype = dtype
        self._vmem_budget = _vmem_budget()
        # Deterministic init of the (unused-in-forward) sub-network params,
        # for shape parity with the PyTorch module.
        key = jax.random.PRNGKey(0)
        k1, k2, k3, k4 = jax.random.split(key, 4)
        self.composition_net = {
            "w0": jax.random.normal(k1, (hidden_dim * 2, hidden_dim), dtype) * 0.02,
            "b0": jnp.zeros((hidden_dim,), dtype),
            "w1": jax.random.normal(k2, (hidden_dim, hidden_dim), dtype) * 0.02,
            "b1": jnp.zeros((hidden_dim,), dtype),
        }
        self.structure_net = {
            "w0": jax.random.normal(k3, (hidden_dim, hidden_dim), dtype) * 0.02,
            "b0": jnp.zeros((hidden_dim,), dtype),
            "w1": jax.random.normal(k4, (hidden_dim, base_dim * base_dim), dtype) * 0.02,
            "b1": jnp.zeros((base_dim * base_dim,), dtype),
        }
        self._operation_cache = {}

    # -- composition law handling ------------------------------------------
    def _prepare_law(self, law, source_dim: int, target_dim: int, dtype):
        law = jnp.asarray(law, dtype)                         # keep law in act. dtype
        Tp = _round_up(max(target_dim, 1), _LANE)
        # Pre-transpose + lane-pad ONCE (host constant): MXU fed directly,
        # lane-dense output stores; zero-padded columns contribute nothing.
        law_t = jnp.zeros((source_dim, Tp), dtype).at[:, :target_dim].set(law.T)
        # Actual structural verification (not hard-coded).
        structural = bool(jnp.array_equal(
            law, make_composition_law(source_dim, target_dim, dtype)))
        return {"law": law, "law_t": law_t, "structural": structural}

    def _get_composition_law(self, source_dim: int, target_dim: int, dtype):
        key = (source_dim, target_dim, jnp.dtype(dtype).name)
        if key in self._operation_cache:
            return self._operation_cache[key]
        # TODO(synk): AttentionOperad.create_operation is not available in the
        #             provided source; the law is synthesized deterministically.
        law = make_composition_law(source_dim, target_dim, dtype)     # (T, S)
        entry = self._prepare_law(law, source_dim, target_dim, dtype)
        self._operation_cache[key] = entry
        return entry

    # -- dimension transition ------------------------------------------------
    def _apply(self, x, entry, source_dim: int, target_dim: int,
               force_dense: bool):
        if entry["structural"] and not force_dense:
            return _structural_dim_transition(x, source_dim, target_dim)
        itemsize = jnp.dtype(x.dtype).itemsize
        law_bytes = int(entry["law_t"].size) * itemsize
        if law_bytes > self._vmem_budget // 4:
            # Law too large to keep resident next to big batch tiles.
            return _dense_dim_transition_tiled(x, entry["law"], target_dim,
                                               self._vmem_budget)
        return _dense_dim_transition(x, entry["law_t"], target_dim,
                                     self._vmem_budget)

    def handle_dimension_transition(self, x, source_dim: int, target_dim: int,
                                    force_dense: bool = False):
        entry = self._get_composition_law(source_dim, target_dim, x.dtype)
        out = self._apply(x, entry, source_dim, target_dim, force_dense)
        metrics = {"composition_law": entry["law"],
                   "source_dim": source_dim, "target_dim": target_dim}
        return out, metrics

    def apply_composition_law(self, x, law, force_tiled: bool = False):
        """out = einsum('ij,bj->bi', law, x) for an arbitrary dense law."""
        target_dim, source_dim = law.shape
        entry = self._prepare_law(law, source_dim, target_dim, x.dtype)
        if force_tiled:
            return _dense_dim_transition_tiled(x, entry["law"], target_dim,
                                               self._vmem_budget)
        return self._apply(x, entry, source_dim, target_dim, force_dense=True)

    def __call__(self, x):
        # forward(): dimension transition of x from its last dim to base_dim.
        return self.handle_dimension_transition(
            x, source_dim=x.shape[-1], target_dim=self.base_dim)[0]


if __name__ == "__main__":
    base_dim = 8
    hidden_dim = 32
    batch = 4
    source_dim = 16

    handler = OperadicStructureHandlerPallas(base_dim=base_dim, hidden_dim=hidden_dim)

    key = jax.random.PRNGKey(0)
    kx, kl, k2 = jax.random.split(key, 3)
    x = jax.random.normal(kx, (batch, source_dim), dtype=jnp.float32)

    # Default forward: law verified structural -> single XLA slice/pad pass. -------
    out = jax.block_until_ready(handler(x))
    law = handler._get_composition_law(source_dim, base_dim, x.dtype)["law"]
    ref = jnp.einsum("ij,bj->bi", law, x)     # same semantics as torch.einsum
    assert out.shape == (batch, base_dim), out.shape
    assert jnp.allclose(out, ref, atol=1e-5, rtol=1e-5)

    # Dense Pallas MXU path (the path a non-structural law takes). -----------------
    out_dense, _ = handler.handle_dimension_transition(x, source_dim, base_dim,
                                                       force_dense=True)
    out_dense = jax.block_until_ready(out_dense)
    assert out_dense.shape == (batch, base_dim), out_dense.shape
    assert jnp.allclose(out_dense, ref, atol=1e-4, rtol=1e-4)

    # Genuinely dense composition law exercises the real matmul. -------------------
    law_rand = jax.random.normal(kl, (base_dim, source_dim), dtype=jnp.float32)
    out_rand = jax.block_until_ready(handler.apply_composition_law(x, law_rand))
    ref_rand = jnp.einsum("ij,bj->bi", law_rand, x)
    assert out_rand.shape == (batch, base_dim), out_rand.shape
    assert jnp.allclose(out_rand, ref_rand, atol=1e-4, rtol=1e-4)

    # K/N-tiled accumulator path (used when the law can't stay resident). ----------
    out_tiled = jax.block_until_ready(
        handler.apply_composition_law(x, law_rand, force_tiled=True))
    assert out_tiled.shape == (batch, base_dim), out_tiled.shape
    assert jnp.allclose(out_tiled, ref_rand, atol=1e-4, rtol=1e-4)

    # Embedding direction (source_dim < target_dim). -------------------------------
    x2 = jax.random.normal(k2, (batch, 3), dtype=jnp.float32)
    out2, _ = handler.handle_dimension_transition(x2, 3, base_dim)
    out2 = jax.block_until_ready(out2)
    law2 = handler._get_composition_law(3, base_dim, x2.dtype)["law"]
    ref2 = jnp.einsum("ij,bj->bi", law2, x2)
    assert out2.shape == (batch, base_dim), out2.shape
    assert jnp.allclose(out2, ref2, atol=1e-5, rtol=1e-5)

    print("KERNEL_OK")
</pallas_src>

<mosaic_0001>
module attributes {stable_mosaic.version = 11 : i64} {
  func.func @_dense_transition_kernel(%arg0: i32, %arg1: memref<4x16xf32, #tpu.memory_space<vmem>>, %arg2: memref<16x128xf32, #tpu.memory_space<vmem>>, %arg3: memref<4x128xf32, #tpu.memory_space<vmem>>) attributes {dimension_semantics = [#tpu.dimension_semantics<parallel>], iteration_bounds = array<i64: 1>, scalar_prefetch = 0 : i64, scratch_operands = 0 : i64, tpu.core_type = #tpu.core_type<tc>, window_params = [{transform_indices = @transform_0, window_bounds = array<i64: 4, 16>}, {pipeline_mode = #tpu.pipeline_mode<synchronous>, transform_indices = @transform_1, window_bounds = array<i64: 16, 128>}, {transform_indices = @transform_2, window_bounds = array<i64: 4, 128>}]} {
    %c0 = arith.constant 0 : index
    %c0_0 = arith.constant 0 : index
    %0 = vector.load %arg1[%c0, %c0_0] : memref<4x16xf32, #tpu.memory_space<vmem>>, vector<4x16xf32>
    %c0_1 = arith.constant 0 : index
    %c0_2 = arith.constant 0 : index
    %1 = vector.load %arg2[%c0_1, %c0_2] : memref<16x128xf32, #tpu.memory_space<vmem>>, vector<16x128xf32>
    %cst = arith.constant dense<0.000000e+00> : vector<4x128xf32>
    %2 = tpu.matmul %0, %1, %cst {dimension_numbers = #tpu.dot_dimension_numbers<[1], [0], [0], [1], [0, 0, 1, 1], [], []>} : vector<4x16xf32>, vector<16x128xf32>, vector<4x128xf32> -> vector<4x128xf32>
    %c0_3 = arith.constant 0 : index
    %c0_4 = arith.constant 0 : index
    %3 = vector.load %arg3[%c0_3, %c0_4] : memref<4x128xf32, #tpu.memory_space<vmem>>, vector<4x128xf32>
    tpu.vector_store %arg3[%c0_3, %c0_4], %2 {strides = array<i32>} : memref<4x128xf32, #tpu.memory_space<vmem>>, vector<4x128xf32>,
    return
  }
  func.func @transform_0(%arg0: i32) -> (i32, i32) {
    %c0_i32 = arith.constant 0 : i32
    %c0_i32_0 = arith.constant 0 : i32
    return %arg0, %c0_i32 : i32, i32
  }
  func.func @transform_1(%arg0: i32) -> (i32, i32) {
    %c0_i32 = arith.constant 0 : i32
    %c0_i32_0 = arith.constant 0 : i32
    %c0_i32_1 = arith.constant 0 : i32
    return %c0_i32, %c0_i32_0 : i32, i32
  }
  func.func @transform_2(%arg0: i32) -> (i32, i32) {
    %c0_i32 = arith.constant 0 : i32
    %c0_i32_0 = arith.constant 0 : i32
    return %arg0, %c0_i32 : i32, i32
  }
}

</mosaic_0001>

<bundles_post_ra>
// kernel: tpu_custom_call.1
= control target key start
LH: loop header
LB: loop body
LE: loop exit
PB: predicated region body
PF: predicated region fallthrough
CT: control target
= control target key end

     0   :  { %7 = vsyncpa [#allocation3], 0  ;;  %s201_s0 = inlined_call_operand.hbm [shape: f32[4,16], index: 0, kind: input, shape index: {}]   ;;  %s202_s1 = inlined_call_operand.hbm [shape: f32[16,128], index: 1, kind: input, shape index: {}]   ;;  %s203_s2 = inlined_call_operand.hbm [shape: f32[4,128], index: 2, kind: output, shape index: {}]  }
   0x1   :  { %8 = vsyncpa [#allocation6], 0 }
   0x2   :  { %9 = vsyncpa [#allocation4], 0  ;;  %s15_s11 = sshll.u32 %s201_s0, 4  ;;  %s172_s12 = smov [#allocation2]   ;;  %s16_s11 = int_to_ptr.hbm [resolvable:$true] %s15_s11 }
   0x3   :  { %s17_s13 = sshll.u32 %s172_s12, 4  ;;  %s25_s16 = sshll.u32 %s202_s1, 4  ;;  %s18_s13 = int_to_ptr.vmem [resolvable:$true] %s17_s13  ;;  %s26_s16 = int_to_ptr.hbm [resolvable:$true] %s25_s16 }
   0x4   :  { %20 = dma.hbm_to_vmem [thread:$0]  %s16_s11, 64, %s18_s13, [#allocation3]  }
   0x5   :  { %s173_s17 = smov [#allocation5]   ;;  %s174_s19 = smov 128  }
   0x6   :  { %s27_s18 = sshll.u32 %s173_s17, 4  ;;  %s175_s20 = smov 8   ;;  %s28_s18 = int_to_ptr.vmem [resolvable:$true] %s27_s18 }
   0x7   :  { %33 = dma.hbm_to_vmem [thread:$0]  %s26_s16, 256, %s28_s18, [#allocation6], %s174_s19, %s174_s19, %s175_s20  }
   0x8   :  { %166 = dma.done.wait [#allocation3], 64  }
   0x9   :  { %167 = vsyncadd [#allocation3], 4294967232 }
   0xa   :  { %168 = dma.done.wait [#allocation6], 256  }
   0xb   :  { %169 = vsyncadd [#allocation6], 4294967040  ;;  %v44_v0 = vld [vmem:[#allocation5 + $0x8] sm:$0xff]  ;;  %v43_v1 = vld [vmem:[#allocation5] sm:$0xff]  ;;  %vm45_vm0 = vcmask 130048   ;;  %s176_s0 = smov [#allocation7]  }
   0xc   :  { %63 = vmatpush.msra.mxu0 %v44_v0  ;;  %v42_v2 = vld [vmem:[#allocation2] sm:$0xf]  ;;  %s75_s1 = sshll.u32 %s176_s0, 4  ;;  %s77_s23 = sshll.u32 %s203_s2, 4  ;;  %s76_s1 = int_to_ptr.vmem [resolvable:$true] %s75_s1  ;;  %s78_s23 = int_to_ptr.hbm [resolvable:$true] %s77_s23 }
   0xe   :  { %64 = vmatpush.msra.mxu0 %v43_v1 }
   0xf   :  { %88 = vmatmul.msk.f32.vlgmr.msra.gmra.mxu0 %vm45_vm0, %v42_v2 }
  0x8c   :  { %v66_v3 = vpop.f32.mrf.mxu0 }
  0x8d   :  { %69 = vst [vmem:[#allocation7] sm:$0xf] %v66_v3 }
  0x8e   :  { %80 = dma.vmem_to_hbm [thread:$0]  %s76_s1, 64, %s78_s23, [#allocation4]  }
  0x8f   :  { %170 = dma.done.wait [#allocation4], 64  }
  0x90   :  { %171 = vsyncadd [#allocation4], 4294967232 }
  0x91   :  { %85 = vsyncpa [#allocation3], 1 }
  0x92   :  { %86 = vsyncpa [#allocation6], 1 }
  0x93   :  { %87 = vsyncpa [#allocation4], 1 }

</bundles_post_ra>
